<compile_context>
chip_gen: v7x
topology: tpu7x:2x2x1
jax: 0.10.0
libtpu: 0.0.40
codegen_flags: <defaults>
</compile_context>

<pallas_src>
import jax
import jax.numpy as jnp
from jax.experimental import pallas as pl
from jax.experimental.pallas import tpu as pltpu


def _layernorm_kernel(x_ref, o_ref, *, eps):
    # x_ref / o_ref: (ROW_TILE, HIDDEN) block in VMEM
    x = x_ref[...].astype(jnp.float32)
    inv_n = 1.0 / x.shape[-1]
    s1 = jnp.sum(x, axis=-1, keepdims=True)
    s2 = jnp.sum(x * x, axis=-1, keepdims=True)
    mean = s1 * inv_n
    var = jnp.maximum(s2 * inv_n - mean * mean, 0.0)
    inv = jax.lax.rsqrt(var + eps)
    o_ref[...] = ((x - mean) * inv).astype(o_ref.dtype)


def _sublane_multiple(dtype) -> int:
    # Native sublane packing: 8 rows for 4-byte, 16 for 2-byte, 32 for 1-byte.
    itemsize = jnp.dtype(dtype).itemsize
    return {4: 8, 2: 16, 1: 32}.get(itemsize, 8)


def layer_norm(
    x,
    eps: float = 1e-5,
    row_tile: int | None = None,
    vmem_budget_bytes: int = 32 * 1024 * 1024,
):
    """LayerNorm over the last dim of x (any leading dims)."""
    orig_shape = x.shape
    hidden = orig_shape[-1]
    rows = 1
    for d in orig_shape[:-1]:
        rows *= d
    x2 = x.reshape(rows, hidden)

    elem = jnp.dtype(x.dtype).itemsize
    sublane = _sublane_multiple(x.dtype)

    if row_tile is None:
        # Resident VMEM ≈ double-buffered input + output tiles plus ~2x tile
        # worth of f32 temporaries inside the kernel.
        per_row_bytes = hidden * (4 * elem + 2 * 4)
        row_tile = (vmem_budget_bytes // per_row_bytes // sublane) * sublane
        row_tile = int(min(max(row_tile, sublane), 2048))
    else:
        row_tile = max(sublane, (int(row_tile) // sublane) * sublane)

    # Never use a tile taller than the (sublane-rounded) row count.
    rows_rounded = ((rows + sublane - 1) // sublane) * sublane
    row_tile = min(row_tile, rows_rounded)

    grid = (pl.cdiv(rows, row_tile),)

    cost = pl.CostEstimate(
        flops=8 * rows * hidden,            # sums, squares, subtract, scale
        transcendentals=rows,               # one rsqrt per row
        bytes_accessed=2 * rows * hidden * elem,  # read x + write out
    )

    out = pl.pallas_call(
        lambda x_ref, o_ref: _layernorm_kernel(x_ref, o_ref, eps=eps),
        out_shape=jax.ShapeDtypeStruct((rows, hidden), x.dtype),
        grid_spec=pltpu.PrefetchScalarGridSpec(
            num_scalar_prefetch=0,
            grid=grid,
            in_specs=[pl.BlockSpec((row_tile, hidden), lambda i: (i, 0))],
            out_specs=pl.BlockSpec((row_tile, hidden), lambda i: (i, 0)),
        ),
        compiler_params=pltpu.CompilerParams(
            dimension_semantics=("parallel",),
            vmem_limit_bytes=48 * 1024 * 1024,
        ),
        cost_estimate=cost,
    )(x2)

    return out.reshape(orig_shape)


def layer_norm_reference(x, eps: float = 1e-5):
    xf = x.astype(jnp.float32)
    mean = jnp.mean(xf, axis=-1, keepdims=True)
    var = jnp.mean((xf - mean) ** 2, axis=-1, keepdims=True)
    return ((xf - mean) / jnp.sqrt(var + eps)).astype(x.dtype)


if __name__ == "__main__":
    key = jax.random.PRNGKey(0)
    batch, seq, hidden = 2, 8, 128
    x = jax.random.normal(key, (batch, seq, hidden), dtype=jnp.float32)

    y = layer_norm(x, eps=1e-5)
    y = jax.block_until_ready(y)

    y_ref = layer_norm_reference(x, eps=1e-5)
    assert y.shape == x.shape
    assert jnp.allclose(y, y_ref, atol=1e-5, rtol=1e-5), "mismatch vs reference"

    print("KERNEL_OK")
</pallas_src>

<mosaic_0001>
module attributes {stable_mosaic.version = 11 : i64} {
  func.func @_lambda_(%arg0: i32, %arg1: memref<16x128xf32, #tpu.memory_space<vmem>>, %arg2: memref<16x128xf32, #tpu.memory_space<vmem>>) attributes {dimension_semantics = [#tpu.dimension_semantics<parallel>], iteration_bounds = array<i64: 1>, scalar_prefetch = 0 : i64, scratch_operands = 0 : i64, tpu.core_type = #tpu.core_type<tc>, window_params = [{transform_indices = @transform_0, window_bounds = array<i64: 16, 128>}, {transform_indices = @transform_1, window_bounds = array<i64: 16, 128>}]} {
    %c0 = arith.constant 0 : index
    %c0_0 = arith.constant 0 : index
    %0 = vector.load %arg1[%c0, %c0_0] : memref<16x128xf32, #tpu.memory_space<vmem>>, vector<16x128xf32>
    %cst = arith.constant dense<0.000000e+00> : vector<16xf32>
    %1 = vector.multi_reduction <add>, %0, %cst [1] : vector<16x128xf32> to vector<16xf32>
    %2 = vector.shape_cast %1 : vector<16xf32> to vector<16x1xf32>
    %3 = arith.mulf %0, %0 : vector<16x128xf32>
    %cst_1 = arith.constant dense<0.000000e+00> : vector<16xf32>
    %4 = vector.multi_reduction <add>, %3, %cst_1 [1] : vector<16x128xf32> to vector<16xf32>
    %5 = vector.shape_cast %4 : vector<16xf32> to vector<16x1xf32>
    %cst_2 = arith.constant 7.812500e-03 : f32
    %6 = vector.broadcast %cst_2 : f32 to vector<16x1xf32>
    %7 = arith.mulf %2, %6 : vector<16x1xf32>
    %cst_3 = arith.constant 7.812500e-03 : f32
    %8 = vector.broadcast %cst_3 : f32 to vector<16x1xf32>
    %9 = arith.mulf %5, %8 : vector<16x1xf32>
    %10 = arith.mulf %7, %7 : vector<16x1xf32>
    %11 = arith.subf %9, %10 : vector<16x1xf32>
    %cst_4 = arith.constant 0.000000e+00 : f32
    %12 = vector.broadcast %cst_4 : f32 to vector<16x1xf32>
    %13 = arith.maximumf %11, %12 : vector<16x1xf32>
    %cst_5 = arith.constant 9.99999974E-6 : f32
    %14 = vector.broadcast %cst_5 : f32 to vector<16x1xf32>
    %15 = arith.addf %13, %14 : vector<16x1xf32>
    %16 = math.rsqrt %15 : vector<16x1xf32>
    %17 = vector.broadcast %7 : vector<16x1xf32> to vector<16x128xf32>
    %18 = arith.subf %0, %17 : vector<16x128xf32>
    %19 = vector.broadcast %16 : vector<16x1xf32> to vector<16x128xf32>
    %20 = arith.mulf %18, %19 : vector<16x128xf32>
    %c0_6 = arith.constant 0 : index
    %c0_7 = arith.constant 0 : index
    %21 = vector.load %arg2[%c0_6, %c0_7] : memref<16x128xf32, #tpu.memory_space<vmem>>, vector<16x128xf32>
    tpu.vector_store %arg2[%c0_6, %c0_7], %20 {strides = array<i32>} : memref<16x128xf32, #tpu.memory_space<vmem>>, vector<16x128xf32>,
    return
  }
  func.func @transform_0(%arg0: i32) -> (i32, i32) {
    %c0_i32 = arith.constant 0 : i32
    %c0_i32_0 = arith.constant 0 : i32
    return %arg0, %c0_i32 : i32, i32
  }
  func.func @transform_1(%arg0: i32) -> (i32, i32) {
    %c0_i32 = arith.constant 0 : i32
    %c0_i32_0 = arith.constant 0 : i32
    return %arg0, %c0_i32 : i32, i32
  }
}

</mosaic_0001>

<bundles_post_ra>
// kernel: tpu_custom_call.1
= control target key start
LH: loop header
LB: loop body
LE: loop exit
PB: predicated region body
PF: predicated region fallthrough
CT: control target
= control target key end

     0   :  { %6 = vsyncpa [#allocation3], 0  ;;  %s172_s0 = inlined_call_operand.hbm [shape: f32[16,128], index: 0, kind: input, shape index: {}]   ;;  %s173_s1 = inlined_call_operand.hbm [shape: f32[16,128], index: 1, kind: output, shape index: {}]  }
   0x1   :  { %7 = vsyncpa [#allocation4], 0  ;;  %s128_s6 = smov [#allocation2]   ;;  %s80_s10 = scalar_lea.hbm %s172_s0, 256 }
   0x2   :  { %s13_s7 = sshll.u32 %s128_s6, 4  ;;  %p81_p0 = scmp.ne.s32.totalorder %s172_s0, %s80_s10  ;;  %s14_s7 = int_to_ptr.vmem [resolvable:$true] %s13_s7 }
   0x3   :  { %p84_p1 = scmp.lt.u32.totalorder %s80_s10, %s172_s0 }
   0x5   :  { %p86_p2 = pnand %p84_p1, %p81_p0 }
   0x7   :  { %89 = shalt.err (!%p86_p2)
}
   0x8   :  { %s90_s15 = scalar_lea.vmem %s14_s7, 256  ;;  %p95_p4 = scmp.lt.s32.totalorder %s14_s7, %s14_s7 }
   0x9   :  { %p91_p3 = scmp.ne.s32.totalorder %s14_s7, %s90_s15  ;;  %p96_p5 = scmp.lt.s32.totalorder %s90_s15, %s90_s15 }
   0xb   :  { %p97_p6 = por %p96_p5, %p95_p4 }
   0xd   :  { %p98_p7 = pnand %p97_p6, %p91_p3 }
   0xf   :  { %101 = shalt.err (!%p98_p7)
}
  0x10   :  { %s129_s16 = smov 128   ;;  %s130_s17 = smov 8  }
  0x11   :  { %19 = dma.hbm_to_vmem [thread:$0]  %s172_s0, 256, %s14_s7, [#allocation3], %s129_s16, %s129_s16, %s130_s17  }
  0x12   :  { %124 = dma.done.wait [#allocation3], 256  }
  0x13   :  { %125 = vsyncadd [#allocation3], 4294967040  ;;  %v23_v0 = vld [vmem:[#allocation2] sm:$0xff]  ;;  %v24_v1 = vld [vmem:[#allocation2 + $0x8] sm:$0xff]  ;;  %s131_s0 = smov [#allocation5]  }
  0x14   :  { %25 = vadd.xlane.f32.xlu0 %v23_v0  ;;  %v29_v2 = vmul.f32 %v23_v0, %v23_v0  ;;  %v30_v3 = vmul.f32 %v24_v1, %v24_v1  ;;  %s60_s20 = sshll.u32 %s131_s0, 4  ;;  %s61_s20 = int_to_ptr.vmem [resolvable:$true] %s60_s20 }
  0x15   :  { %s102_s21 = scalar_lea.vmem %s61_s20, 256  ;;  %p107_p9 = scmp.lt.s32.totalorder %s61_s20, %s61_s20 }
  0x16   :  { %31 = vadd.xlane.f32.xlu1 %v29_v2  ;;  %p103_p8 = scmp.ne.s32.totalorder %s61_s20, %s102_s21  ;;  %p108_p10 = scmp.lt.s32.totalorder %s102_s21, %s102_s21 }
  0x18   :  { %27 = vadd.xlane.f32.xlu0 %v24_v1  ;;  %p109_p11 = por %p108_p10, %p107_p9 }
  0x1a   :  { %33 = vadd.xlane.f32.xlu1 %v30_v3  ;;  %p110_p12 = pnand %p109_p11, %p103_p8 }
  0xa1   :  { %v26_v4 = vpop.xlane.xlu0 %25 }
  0xa2   :  { %v35_v5 = vmul.f32 0.0078125, %v26_v4 }
  0xa3   :  { %v32_v6 = vpop.xlane.xlu1 %31 }
  0xa4   :  { %v39_v7 = vmul.f32 %v35_v5, %v35_v5  ;;  %v37_v8 = vmul.f32 0.0078125, %v32_v6  ;;  %v49_v20 = vsub.f32 %v23_v0, %v35_v5 }
  0xa5   :  { %v28_v9 = vpop.xlane.xlu0 %27 }
  0xa6   :  { %v41_v10 = vsub.f32 %v37_v8, %v39_v7  ;;  %v36_v11 = vmul.f32 0.0078125, %v28_v9 }
  0xa7   :  { %v34_v12 = vpop.xlane.xlu1 %33 }
  0xa8   :  { %v43_v13 = vmax.f32 %v41_v10, 0.0  ;;  %v40_v14 = vmul.f32 %v36_v11, %v36_v11  ;;  %v38_v15 = vmul.f32 0.0078125, %v34_v12  ;;  %v50_v23 = vsub.f32 %v24_v1, %v36_v11 }
  0xaa   :  { %v45_v16 = vadd.f32 1e-05, %v43_v13  ;;  %v42_v17 = vsub.f32 %v38_v15, %v40_v14 }
  0xac   :  { %76 = vrsqrt.f32 %v45_v16  ;;  %v44_v18 = vmax.f32 %v42_v17, 0.0 }
  0xae   :  { %v46_v19 = vadd.f32 1e-05, %v44_v18 }
  0xb0   :  { %78 = vrsqrt.f32 %v46_v19 }
  0xb6   :  { %v77_v21 = vpop.eup %76 }
  0xb7   :  { %v51_v22 = vmul.f32 %v77_v21, %v49_v20 }
  0xb9   :  { %53 = vst [vmem:[#allocation5] sm:$0xff] %v51_v22 }
  0xba   :  { %v79_v24 = vpop.eup %78 }
  0xbb   :  { %v52_v25 = vmul.f32 %v79_v24, %v50_v23 }
  0xbd   :  { %54 = vst [vmem:[#allocation5 + $0x8] sm:$0xff] %v52_v25 }
  0xbe   :  { %113 = shalt.err (!%p110_p12)
}
  0xbf   :  { %s114_s24 = scalar_lea.hbm %s173_s1, 256 }
  0xc0   :  { %p115_p13 = scmp.ne.s32.totalorder %s173_s1, %s114_s24  ;;  %p118_p0 = scmp.lt.u32.totalorder %s114_s24, %s173_s1 }
  0xc2   :  { %p120_p1 = pnand %p118_p0, %p115_p13 }
  0xc4   :  { %123 = shalt.err (!%p120_p1)
}
  0xc5   :  { %66 = dma.vmem_to_hbm [thread:$0]  %s61_s20, 256, %s173_s1, [#allocation4], %s129_s16, %s129_s16, %s130_s17  }
  0xc6   :  { %126 = dma.done.wait [#allocation4], 256  }
  0xc7   :  { %127 = vsyncadd [#allocation4], 4294967040 }
  0xc8   :  { %70 = vsyncpa [#allocation3], 1 }
  0xc9   :  { %71 = vsyncpa [#allocation4], 1 }

</bundles_post_ra>
